<compile_context>
chip_gen: v7x
topology: tpu7x:2x2x1
jax: 0.10.0
libtpu: 0.0.40
codegen_flags: <defaults>
</compile_context>

<pallas_src>
import jax
import jax.numpy as jnp
from jax.experimental import pallas as pl
from jax.experimental.pallas import tpu as pltpu

_LANE = 128
_MAX_M_BLOCK = 2048          # lane-dim tile for conv kernels (fits v5e 16 MiB too)
_MAX_N_BLOCK = 256           # row-dim tile for the fc chain
_VMEM_LIMIT = 32 * 1024 * 1024   # explicit scoped-VMEM limit (ok on v5e/v6e/v7x)

_KP1 = 80                    # round_up(3 * 5 * 5, 16)
_KP2 = 208                   # round_up(8 * 5 * 5, 16)  (conv1 Cout padded to 8)


def _round_up(v, m):
    return (v + m - 1) // m * m


def _pick_lane_tiling(m):
    """(block, padded_total): block % 128 == 0, padded_total % block == 0,
    >=2 blocks when possible (v7x megacore), block <= _MAX_M_BLOCK."""
    mp = _round_up(m, _LANE)
    if mp <= _LANE:
        return mp, mp
    g = max(2, pl.cdiv(mp, _MAX_M_BLOCK))
    mb = _round_up(pl.cdiv(mp, g), _LANE)
    return mb, _round_up(mp, mb)


def _pick_row_tiling(n):
    """(block, padded_total) for the fc-chain batch axis (sublane granule 8)."""
    npad = _round_up(n, 8)
    if npad <= 8:
        return npad, npad
    g = max(2, pl.cdiv(npad, _MAX_N_BLOCK))
    nb = _round_up(pl.cdiv(npad, g), 8)
    return nb, _round_up(npad, nb)


# ----------------------------- Pallas kernels ------------------------------

def _conv_pool_kernel(slabs_ref, w_ref, b_ref, o_ref):
    """Fused conv(as matmul) + bias + ReLU + MaxPool(2,2).

    slabs_ref: (4, Kp, MB) bf16 im2col columns, one slab per 2x2 pool phase;
               lane axis = pooled positions (n, hp, wp) -> lane-dense.
    w_ref:     (Cout, Kp) bf16 PyTorch-flattened conv weight (zero-padded in K).
    b_ref:     (Cout, 1)  f32
    o_ref:     (Cout, MB) bf16 pooled activation (channel-major / transposed).
    """
    w = w_ref[...]
    s = jnp.dot(w, slabs_ref[0], preferred_element_type=jnp.float32)
    for q in range(1, 4):
        s = jnp.maximum(
            s, jnp.dot(w, slabs_ref[q], preferred_element_type=jnp.float32))
    # max_q relu(s_q + b) == relu(max_q(s_q) + b): shared bias, monotone ReLU.
    o_ref[...] = jnp.maximum(s + b_ref[...], 0.0).astype(o_ref.dtype)


def _fc_chain_kernel(x_ref, w1_ref, b1_ref, w2_ref, b2_ref, w3_ref, b3_ref,
                     o_ref):
    """fc1+ReLU -> fc2+ReLU -> fc3, fused; intermediates never leave VMEM."""
    h = jnp.dot(x_ref[...], w1_ref[...], preferred_element_type=jnp.float32)
    h = jnp.maximum(h + b1_ref[...], 0.0).astype(jnp.bfloat16)
    h = jnp.dot(h, w2_ref[...], preferred_element_type=jnp.float32)
    h = jnp.maximum(h + b2_ref[...], 0.0).astype(jnp.bfloat16)
    h = jnp.dot(h, w3_ref[...], preferred_element_type=jnp.float32)
    o_ref[...] = h + b3_ref[...]


# ------------------------------ Pallas wrappers ----------------------------

def conv_pool_pallas(slabs, w, b, mb):
    """slabs: (4, Kp, Mp_pad) bf16; w: (Cout, Kp) bf16; b: (Cout, 1) f32
    -> (Cout, Mp_pad) bf16."""
    _, kp, mp_pad = slabs.shape
    cout = w.shape[0]
    grid = (mp_pad // mb,)
    return pl.pallas_call(
        _conv_pool_kernel,
        out_shape=jax.ShapeDtypeStruct((cout, mp_pad), jnp.bfloat16),
        grid=grid,
        in_specs=[
            pl.BlockSpec((4, kp, mb), lambda m: (0, 0, m)),
            pl.BlockSpec((cout, kp), lambda m: (0, 0)),
            pl.BlockSpec((cout, 1), lambda m: (0, 0)),
        ],
        out_specs=pl.BlockSpec((cout, mb), lambda m: (0, m)),
        compiler_params=pltpu.CompilerParams(
            dimension_semantics=("parallel",),
            vmem_limit_bytes=_VMEM_LIMIT),
    )(slabs, w, b)


def fc_chain_pallas(x, w1, b1, w2, b2, w3, b3, nb):
    """x: (Npad, 400) bf16; padded (K,128) bf16 weights / (1,128) f32 biases
    -> (Npad, 128) f32 logits (cols >= 10 are zero)."""
    npad, k = x.shape
    o = w3.shape[1]
    grid = (npad // nb,)
    full = lambda m: (0, 0)
    return pl.pallas_call(
        _fc_chain_kernel,
        out_shape=jax.ShapeDtypeStruct((npad, o), jnp.float32),
        grid=grid,
        in_specs=[
            pl.BlockSpec((nb, k), lambda m: (m, 0)),
            pl.BlockSpec(w1.shape, full),
            pl.BlockSpec(b1.shape, full),
            pl.BlockSpec(w2.shape, full),
            pl.BlockSpec(b2.shape, full),
            pl.BlockSpec(w3.shape, full),
            pl.BlockSpec(b3.shape, full),
        ],
        out_specs=pl.BlockSpec((nb, o), lambda m: (m, 0)),
        compiler_params=pltpu.CompilerParams(
            dimension_semantics=("parallel",),
            vmem_limit_bytes=_VMEM_LIMIT),
    )(x, w1, b1, w2, b2, w3, b3)


# ------------------------------ im2col glue --------------------------------

def _pool_im2col_slabs(x, ksz, kp, channels_first):
    """Build pool-phase-grouped im2col slabs (bf16).

    x: (N, C, H, W) if not channels_first else (C, N, H, W).
    Returns slabs (4, kp, Mp_pad) and (Hp, Wp, Mp, MB).  Slab q=(ph,pw) holds
    the columns for conv outputs at (2*hp+ph, 2*wp+pw); rows ordered
    (ci, kh, kw) to match PyTorch weight flattening; columns ordered
    (n, hp, wp); zero-padded to (kp, Mp_pad) with Mp_pad an exact multiple of
    the chosen lane block MB.  The NCHW->CNHW transpose is folded into the
    per-tap slices (no separately materialized transposed copy of x).
    """
    if channels_first:
        c, n, h, w = x.shape
    else:
        n, c, h, w = x.shape
    ho, wo = h - ksz + 1, w - ksz + 1
    hp, wp = ho // 2, wo // 2
    mp = n * hp * wp
    k = c * ksz * ksz
    assert kp >= k
    mb, mp_pad = _pick_lane_tiling(mp)

    slabs = []
    for ph in range(2):
        for pw in range(2):
            taps = []
            for kh in range(ksz):
                for kw in range(ksz):
                    h0, w0 = ph + kh, pw + kw
                    if channels_first:
                        sl = jax.lax.slice(
                            x, (0, 0, h0, w0),
                            (c, n, h0 + 2 * hp - 1, w0 + 2 * wp - 1),
                            (1, 1, 2, 2))                    # (C, N, Hp, Wp)
                    else:
                        sl = jax.lax.slice(
                            x, (0, 0, h0, w0),
                            (n, c, h0 + 2 * hp - 1, w0 + 2 * wp - 1),
                            (1, 1, 2, 2))                    # (N, C, Hp, Wp)
                        sl = jnp.transpose(sl, (1, 0, 2, 3)) # fused into slab
                    taps.append(sl)
            t = jnp.stack(taps, axis=1)                      # (C, K*K, N, Hp, Wp)
            slabs.append(t.reshape(k, mp))
    s = jnp.stack(slabs, axis=0)                             # (4, K, Mp)
    s = jnp.pad(s, ((0, 0), (0, kp - k), (0, mp_pad - mp)))
    return s, (hp, wp, mp, mb)


# --------------------------------- Model -----------------------------------

def init_params(key):
    """Deterministic PyTorch-default-style init (uniform +/- 1/sqrt(fan_in))."""
    ks = jax.random.split(key, 10)

    def u(k, shape, fan_in):
        bound = 1.0 / float(fan_in) ** 0.5
        return jax.random.uniform(k, shape, jnp.float32, -bound, bound)

    return {
        "conv1_w": u(ks[0], (6, 3, 5, 5), 3 * 5 * 5),
        "conv1_b": u(ks[1], (6,), 3 * 5 * 5),
        "conv2_w": u(ks[2], (16, 6, 5, 5), 6 * 5 * 5),
        "conv2_b": u(ks[3], (16,), 6 * 5 * 5),
        "fc1_w":   u(ks[4], (120, 16 * 5 * 5), 16 * 5 * 5),
        "fc1_b":   u(ks[5], (120,), 16 * 5 * 5),
        "fc2_w":   u(ks[6], (84, 120), 120),
        "fc2_b":   u(ks[7], (84,), 120),
        "fc3_w":   u(ks[8], (10, 84), 84),
        "fc3_b":   u(ks[9], (10,), 84),
    }


def prepare_params(p):
    """One-time flatten/transpose/zero-pad/bf16-cast of PyTorch-layout params
    into kernel-ready tensors (NOT done per forward step)."""
    def padr(a, rows, cols):
        return jnp.pad(a, ((0, rows - a.shape[0]), (0, cols - a.shape[1])))

    c1w = p["conv1_w"].reshape(6, 3 * 25)
    # conv1 Cout padded 6 -> 8; conv2 consumes the padded channels with zero
    # weight rows so no channel slice is needed between the conv stages.
    c2w = jnp.pad(p["conv2_w"], ((0, 0), (0, 2), (0, 0), (0, 0))).reshape(16, 8 * 25)
    return {
        "c1w": padr(c1w, 8, _KP1).astype(jnp.bfloat16),                 # (8, 80)
        "c1b": padr(p["conv1_b"].reshape(6, 1), 8, 1),                  # (8, 1) f32
        "c2w": padr(c2w, 16, _KP2).astype(jnp.bfloat16),                # (16, 208)
        "c2b": p["conv2_b"].reshape(16, 1),                             # (16, 1) f32
        "f1w": padr(p["fc1_w"].T, 400, 128).astype(jnp.bfloat16),       # (400, 128)
        "f1b": padr(p["fc1_b"].reshape(1, -1), 1, 128),
        "f2w": padr(p["fc2_w"].T, 128, 128).astype(jnp.bfloat16),
        "f2b": padr(p["fc2_b"].reshape(1, -1), 1, 128),
        "f3w": padr(p["fc3_w"].T, 128, 128).astype(jnp.bfloat16),
        "f3b": padr(p["fc3_b"].reshape(1, -1), 1, 128),
    }


def net_forward(prep, x):
    # x: (N, 3, 32, 32) NCHW f32  ->  logits (N, 10) f32
    n = x.shape[0]
    xb = x.astype(jnp.bfloat16)

    # conv1 + ReLU + pool (fused kernel, lane-dense transposed bf16 output)
    s1, (hp1, wp1, mp1, mb1) = _pool_im2col_slabs(xb, 5, _KP1, channels_first=False)
    p1 = conv_pool_pallas(s1, prep["c1w"], prep["c1b"], mb1)    # (8, mp1_pad)
    p1 = p1[:, :mp1].reshape(8, n, hp1, wp1)                    # (8, N, 14, 14)

    # conv2 + ReLU + pool (fused), consuming p1 in its produced layout
    s2, (hp2, wp2, mp2, mb2) = _pool_im2col_slabs(p1, 5, _KP2, channels_first=True)
    p2 = conv_pool_pallas(s2, prep["c2w"], prep["c2b"], mb2)    # (16, mp2_pad)
    p2 = p2[:, :mp2].reshape(16, n, hp2, wp2)                   # (16, N, 5, 5)

    # flatten in PyTorch x.view(-1, 400) order (c, h, w); tiny (16*25/sample)
    xfc = jnp.transpose(p2, (1, 0, 2, 3)).reshape(n, 16 * hp2 * wp2)   # (N, 400)

    # pad batch rows to the chosen row tile (unmasked sublane stores)
    nb, npad = _pick_row_tiling(n)
    if npad != n:
        xfc = jnp.pad(xfc, ((0, npad - n), (0, 0)))

    # fc1+ReLU -> fc2+ReLU -> fc3 in one fused kernel (outputs padded to 128)
    out = fc_chain_pallas(xfc, prep["f1w"], prep["f1b"],
                          prep["f2w"], prep["f2b"],
                          prep["f3w"], prep["f3b"], nb)         # (Npad, 128) f32
    return out[:n, :10]


# ---------------------------------- Main ------------------------------------

if __name__ == "__main__":
    key = jax.random.PRNGKey(0)
    pkey, xkey = jax.random.split(key)
    params = init_params(pkey)
    prep = prepare_params(params)   # weights flattened/padded/bf16-cast once
    # Spatial size 32 is forced by fc1's 16*5*5 input; batch kept small.
    x = jax.random.normal(xkey, (2, 3, 32, 32), jnp.float32)

    fwd = jax.jit(net_forward)
    out = jax.block_until_ready(fwd(prep, x))

    assert out.shape == (2, 10), out.shape
    assert out.dtype == jnp.float32, out.dtype
    assert bool(jnp.all(jnp.isfinite(out))), "non-finite logits"
    print("KERNEL_OK")
</pallas_src>

<mosaic_0001>
module attributes {stable_mosaic.version = 11 : i64} {
  func.func @_conv_pool_kernel(%arg0: i32, %arg1: memref<4x80x256xbf16, #tpu.memory_space<vmem>>, %arg2: memref<8x80xbf16, #tpu.memory_space<vmem>>, %arg3: memref<8x1xf32, #tpu.memory_space<vmem>>, %arg4: memref<8x256xbf16, #tpu.memory_space<vmem>>) attributes {dimension_semantics = [#tpu.dimension_semantics<parallel>], iteration_bounds = array<i64: 2>, scalar_prefetch = 0 : i64, scratch_operands = 0 : i64, tpu.core_type = #tpu.core_type<tc>, window_params = [{transform_indices = @transform_0, window_bounds = array<i64: 4, 80, 256>}, {pipeline_mode = #tpu.pipeline_mode<synchronous>, transform_indices = @transform_1, window_bounds = array<i64: 8, 80>}, {pipeline_mode = #tpu.pipeline_mode<synchronous>, transform_indices = @transform_2, window_bounds = array<i64: 8, 1>}, {transform_indices = @transform_3, window_bounds = array<i64: 8, 256>}]} {
    %c0 = arith.constant 0 : index
    %c0_0 = arith.constant 0 : index
    %0 = vector.load %arg2[%c0, %c0_0] : memref<8x80xbf16, #tpu.memory_space<vmem>>, vector<8x80xbf16>
    %c0_1 = arith.constant 0 : index
    %c0_2 = arith.constant 0 : index
    %c0_3 = arith.constant 0 : index
    %1 = vector.load %arg1[%c0_1, %c0_2, %c0_3] : memref<4x80x256xbf16, #tpu.memory_space<vmem>>, vector<1x80x256xbf16>
    %2 = vector.shape_cast %1 : vector<1x80x256xbf16> to vector<80x256xbf16>
    %cst = arith.constant dense<0.000000e+00> : vector<8x256xf32>
    %3 = tpu.matmul %0, %2, %cst {dimension_numbers = #tpu.dot_dimension_numbers<[1], [0], [0], [1], [0, 0, 1, 1], [], []>} : vector<8x80xbf16>, vector<80x256xbf16>, vector<8x256xf32> -> vector<8x256xf32>
    %c1 = arith.constant 1 : index
    %c0_4 = arith.constant 0 : index
    %c0_5 = arith.constant 0 : index
    %4 = vector.load %arg1[%c1, %c0_4, %c0_5] : memref<4x80x256xbf16, #tpu.memory_space<vmem>>, vector<1x80x256xbf16>
    %5 = vector.shape_cast %4 : vector<1x80x256xbf16> to vector<80x256xbf16>
    %cst_6 = arith.constant dense<0.000000e+00> : vector<8x256xf32>
    %6 = tpu.matmul %0, %5, %cst_6 {dimension_numbers = #tpu.dot_dimension_numbers<[1], [0], [0], [1], [0, 0, 1, 1], [], []>} : vector<8x80xbf16>, vector<80x256xbf16>, vector<8x256xf32> -> vector<8x256xf32>
    %7 = arith.maximumf %3, %6 : vector<8x256xf32>
    %c2 = arith.constant 2 : index
    %c0_7 = arith.constant 0 : index
    %c0_8 = arith.constant 0 : index
    %8 = vector.load %arg1[%c2, %c0_7, %c0_8] : memref<4x80x256xbf16, #tpu.memory_space<vmem>>, vector<1x80x256xbf16>
    %9 = vector.shape_cast %8 : vector<1x80x256xbf16> to vector<80x256xbf16>
    %cst_9 = arith.constant dense<0.000000e+00> : vector<8x256xf32>
    %10 = tpu.matmul %0, %9, %cst_9 {dimension_numbers = #tpu.dot_dimension_numbers<[1], [0], [0], [1], [0, 0, 1, 1], [], []>} : vector<8x80xbf16>, vector<80x256xbf16>, vector<8x256xf32> -> vector<8x256xf32>
    %11 = arith.maximumf %7, %10 : vector<8x256xf32>
    %c3 = arith.constant 3 : index
    %c0_10 = arith.constant 0 : index
    %c0_11 = arith.constant 0 : index
    %12 = vector.load %arg1[%c3, %c0_10, %c0_11] : memref<4x80x256xbf16, #tpu.memory_space<vmem>>, vector<1x80x256xbf16>
    %13 = vector.shape_cast %12 : vector<1x80x256xbf16> to vector<80x256xbf16>
    %cst_12 = arith.constant dense<0.000000e+00> : vector<8x256xf32>
    %14 = tpu.matmul %0, %13, %cst_12 {dimension_numbers = #tpu.dot_dimension_numbers<[1], [0], [0], [1], [0, 0, 1, 1], [], []>} : vector<8x80xbf16>, vector<80x256xbf16>, vector<8x256xf32> -> vector<8x256xf32>
    %15 = arith.maximumf %11, %14 : vector<8x256xf32>
    %c0_13 = arith.constant 0 : index
    %c0_14 = arith.constant 0 : index
    %16 = vector.load %arg3[%c0_13, %c0_14] : memref<8x1xf32, #tpu.memory_space<vmem>>, vector<8x1xf32>
    %17 = vector.broadcast %16 : vector<8x1xf32> to vector<8x256xf32>
    %18 = arith.addf %15, %17 : vector<8x256xf32>
    %cst_15 = arith.constant 0.000000e+00 : f32
    %19 = vector.broadcast %cst_15 : f32 to vector<8x256xf32>
    %20 = arith.maximumf %18, %19 : vector<8x256xf32>
    %21 = arith.truncf %20 : vector<8x256xf32> to vector<8x256xbf16>
    %c0_16 = arith.constant 0 : index
    %c0_17 = arith.constant 0 : index
    %22 = vector.load %arg4[%c0_16, %c0_17] : memref<8x256xbf16, #tpu.memory_space<vmem>>, vector<8x256xbf16>
    tpu.vector_store %arg4[%c0_16, %c0_17], %21 {strides = array<i32>} : memref<8x256xbf16, #tpu.memory_space<vmem>>, vector<8x256xbf16>,
    return
  }
  func.func @transform_0(%arg0: i32) -> (i32, i32, i32) {
    %c0_i32 = arith.constant 0 : i32
    %c0_i32_0 = arith.constant 0 : i32
    %c0_i32_1 = arith.constant 0 : i32
    return %c0_i32, %c0_i32_0, %arg0 : i32, i32, i32
  }
  func.func @transform_1(%arg0: i32) -> (i32, i32) {
    %c0_i32 = arith.constant 0 : i32
    %c0_i32_0 = arith.constant 0 : i32
    %c0_i32_1 = arith.constant 0 : i32
    return %c0_i32, %c0_i32_0 : i32, i32
  }
  func.func @transform_2(%arg0: i32) -> (i32, i32) {
    %c0_i32 = arith.constant 0 : i32
    %c0_i32_0 = arith.constant 0 : i32
    %c0_i32_1 = arith.constant 0 : i32
    return %c0_i32, %c0_i32_0 : i32, i32
  }
  func.func @transform_3(%arg0: i32) -> (i32, i32) {
    %c0_i32 = arith.constant 0 : i32
    %c0_i32_0 = arith.constant 0 : i32
    return %c0_i32, %arg0 : i32, i32
  }
}

module attributes {stable_mosaic.version = 11 : i64} {
  func.func @_conv_pool_kernel(%arg0: i32, %arg1: memref<4x208x128xbf16, #tpu.memory_space<vmem>>, %arg2: memref<16x208xbf16, #tpu.memory_space<vmem>>, %arg3: memref<16x1xf32, #tpu.memory_space<vmem>>, %arg4: memref<16x128xbf16, #tpu.memory_space<vmem>>) attributes {dimension_semantics = [#tpu.dimension_semantics<parallel>], iteration_bounds = array<i64: 1>, scalar_prefetch = 0 : i64, scratch_operands = 0 : i64, tpu.core_type = #tpu.core_type<tc>, window_params = [{transform_indices = @transform_0, window_bounds = array<i64: 4, 208, 128>}, {pipeline_mode = #tpu.pipeline_mode<synchronous>, transform_indices = @transform_1, window_bounds = array<i64: 16, 208>}, {pipeline_mode = #tpu.pipeline_mode<synchronous>, transform_indices = @transform_2, window_bounds = array<i64: 16, 1>}, {transform_indices = @transform_3, window_bounds = array<i64: 16, 128>}]} {
    %c0 = arith.constant 0 : index
    %c0_0 = arith.constant 0 : index
    %0 = vector.load %arg2[%c0, %c0_0] : memref<16x208xbf16, #tpu.memory_space<vmem>>, vector<16x208xbf16>
    %c0_1 = arith.constant 0 : index
    %c0_2 = arith.constant 0 : index
    %c0_3 = arith.constant 0 : index
    %1 = vector.load %arg1[%c0_1, %c0_2, %c0_3] : memref<4x208x128xbf16, #tpu.memory_space<vmem>>, vector<1x208x128xbf16>
    %2 = vector.shape_cast %1 : vector<1x208x128xbf16> to vector<208x128xbf16>
    %cst = arith.constant dense<0.000000e+00> : vector<16x128xf32>
    %3 = tpu.matmul %0, %2, %cst {dimension_numbers = #tpu.dot_dimension_numbers<[1], [0], [0], [1], [0, 0, 1, 1], [], []>} : vector<16x208xbf16>, vector<208x128xbf16>, vector<16x128xf32> -> vector<16x128xf32>
    %c1 = arith.constant 1 : index
    %c0_4 = arith.constant 0 : index
    %c0_5 = arith.constant 0 : index
    %4 = vector.load %arg1[%c1, %c0_4, %c0_5] : memref<4x208x128xbf16, #tpu.memory_space<vmem>>, vector<1x208x128xbf16>
    %5 = vector.shape_cast %4 : vector<1x208x128xbf16> to vector<208x128xbf16>
    %cst_6 = arith.constant dense<0.000000e+00> : vector<16x128xf32>
    %6 = tpu.matmul %0, %5, %cst_6 {dimension_numbers = #tpu.dot_dimension_numbers<[1], [0], [0], [1], [0, 0, 1, 1], [], []>} : vector<16x208xbf16>, vector<208x128xbf16>, vector<16x128xf32> -> vector<16x128xf32>
    %7 = arith.maximumf %3, %6 : vector<16x128xf32>
    %c2 = arith.constant 2 : index
    %c0_7 = arith.constant 0 : index
    %c0_8 = arith.constant 0 : index
    %8 = vector.load %arg1[%c2, %c0_7, %c0_8] : memref<4x208x128xbf16, #tpu.memory_space<vmem>>, vector<1x208x128xbf16>
    %9 = vector.shape_cast %8 : vector<1x208x128xbf16> to vector<208x128xbf16>
    %cst_9 = arith.constant dense<0.000000e+00> : vector<16x128xf32>
    %10 = tpu.matmul %0, %9, %cst_9 {dimension_numbers = #tpu.dot_dimension_numbers<[1], [0], [0], [1], [0, 0, 1, 1], [], []>} : vector<16x208xbf16>, vector<208x128xbf16>, vector<16x128xf32> -> vector<16x128xf32>
    %11 = arith.maximumf %7, %10 : vector<16x128xf32>
    %c3 = arith.constant 3 : index
    %c0_10 = arith.constant 0 : index
    %c0_11 = arith.constant 0 : index
    %12 = vector.load %arg1[%c3, %c0_10, %c0_11] : memref<4x208x128xbf16, #tpu.memory_space<vmem>>, vector<1x208x128xbf16>
    %13 = vector.shape_cast %12 : vector<1x208x128xbf16> to vector<208x128xbf16>
    %cst_12 = arith.constant dense<0.000000e+00> : vector<16x128xf32>
    %14 = tpu.matmul %0, %13, %cst_12 {dimension_numbers = #tpu.dot_dimension_numbers<[1], [0], [0], [1], [0, 0, 1, 1], [], []>} : vector<16x208xbf16>, vector<208x128xbf16>, vector<16x128xf32> -> vector<16x128xf32>
    %15 = arith.maximumf %11, %14 : vector<16x128xf32>
    %c0_13 = arith.constant 0 : index
    %c0_14 = arith.constant 0 : index
    %16 = vector.load %arg3[%c0_13, %c0_14] : memref<16x1xf32, #tpu.memory_space<vmem>>, vector<16x1xf32>
    %17 = vector.broadcast %16 : vector<16x1xf32> to vector<16x128xf32>
    %18 = arith.addf %15, %17 : vector<16x128xf32>
    %cst_15 = arith.constant 0.000000e+00 : f32
    %19 = vector.broadcast %cst_15 : f32 to vector<16x128xf32>
    %20 = arith.maximumf %18, %19 : vector<16x128xf32>
    %21 = arith.truncf %20 : vector<16x128xf32> to vector<16x128xbf16>
    %c0_16 = arith.constant 0 : index
    %c0_17 = arith.constant 0 : index
    %22 = vector.load %arg4[%c0_16, %c0_17] : memref<16x128xbf16, #tpu.memory_space<vmem>>, vector<16x128xbf16>
    tpu.vector_store %arg4[%c0_16, %c0_17], %21 {strides = array<i32>} : memref<16x128xbf16, #tpu.memory_space<vmem>>, vector<16x128xbf16>,
    return
  }
  func.func @transform_0(%arg0: i32) -> (i32, i32, i32) {
    %c0_i32 = arith.constant 0 : i32
    %c0_i32_0 = arith.constant 0 : i32
    %c0_i32_1 = arith.constant 0 : i32
    return %c0_i32, %c0_i32_0, %arg0 : i32, i32, i32
  }
  func.func @transform_1(%arg0: i32) -> (i32, i32) {
    %c0_i32 = arith.constant 0 : i32
    %c0_i32_0 = arith.constant 0 : i32
    %c0_i32_1 = arith.constant 0 : i32
    return %c0_i32, %c0_i32_0 : i32, i32
  }
  func.func @transform_2(%arg0: i32) -> (i32, i32) {
    %c0_i32 = arith.constant 0 : i32
    %c0_i32_0 = arith.constant 0 : i32
    %c0_i32_1 = arith.constant 0 : i32
    return %c0_i32, %c0_i32_0 : i32, i32
  }
  func.func @transform_3(%arg0: i32) -> (i32, i32) {
    %c0_i32 = arith.constant 0 : i32
    %c0_i32_0 = arith.constant 0 : i32
    return %c0_i32, %arg0 : i32, i32
  }
}

module attributes {stable_mosaic.version = 11 : i64} {
  func.func @_fc_chain_kernel(%arg0: i32, %arg1: memref<8x400xbf16, #tpu.memory_space<vmem>>, %arg2: memref<400x128xbf16, #tpu.memory_space<vmem>>, %arg3: memref<1x128xf32, #tpu.memory_space<vmem>>, %arg4: memref<128x128xbf16, #tpu.memory_space<vmem>>, %arg5: memref<1x128xf32, #tpu.memory_space<vmem>>, %arg6: memref<128x128xbf16, #tpu.memory_space<vmem>>, %arg7: memref<1x128xf32, #tpu.memory_space<vmem>>, %arg8: memref<8x128xf32, #tpu.memory_space<vmem>>) attributes {dimension_semantics = [#tpu.dimension_semantics<parallel>], iteration_bounds = array<i64: 1>, scalar_prefetch = 0 : i64, scratch_operands = 0 : i64, tpu.core_type = #tpu.core_type<tc>, window_params = [{transform_indices = @transform_0, window_bounds = array<i64: 8, 400>}, {pipeline_mode = #tpu.pipeline_mode<synchronous>, transform_indices = @transform_1, window_bounds = array<i64: 400, 128>}, {pipeline_mode = #tpu.pipeline_mode<synchronous>, transform_indices = @transform_2, window_bounds = array<i64: 1, 128>}, {pipeline_mode = #tpu.pipeline_mode<synchronous>, transform_indices = @transform_3, window_bounds = array<i64: 128, 128>}, {pipeline_mode = #tpu.pipeline_mode<synchronous>, transform_indices = @transform_4, window_bounds = array<i64: 1, 128>}, {pipeline_mode = #tpu.pipeline_mode<synchronous>, transform_indices = @transform_5, window_bounds = array<i64: 128, 128>}, {pipeline_mode = #tpu.pipeline_mode<synchronous>, transform_indices = @transform_6, window_bounds = array<i64: 1, 128>}, {transform_indices = @transform_7, window_bounds = array<i64: 8, 128>}]} {
    %c0 = arith.constant 0 : index
    %c0_0 = arith.constant 0 : index
    %0 = vector.load %arg1[%c0, %c0_0] : memref<8x400xbf16, #tpu.memory_space<vmem>>, vector<8x400xbf16>
    %c0_1 = arith.constant 0 : index
    %c0_2 = arith.constant 0 : index
    %1 = vector.load %arg2[%c0_1, %c0_2] : memref<400x128xbf16, #tpu.memory_space<vmem>>, vector<400x128xbf16>
    %cst = arith.constant dense<0.000000e+00> : vector<8x128xf32>
    %2 = tpu.matmul %0, %1, %cst {dimension_numbers = #tpu.dot_dimension_numbers<[1], [0], [0], [1], [0, 0, 1, 1], [], []>} : vector<8x400xbf16>, vector<400x128xbf16>, vector<8x128xf32> -> vector<8x128xf32>
    %c0_3 = arith.constant 0 : index
    %c0_4 = arith.constant 0 : index
    %3 = vector.load %arg3[%c0_3, %c0_4] : memref<1x128xf32, #tpu.memory_space<vmem>>, vector<1x128xf32>
    %4 = vector.broadcast %3 : vector<1x128xf32> to vector<8x128xf32>
    %5 = arith.addf %2, %4 : vector<8x128xf32>
    %cst_5 = arith.constant 0.000000e+00 : f32
    %6 = vector.broadcast %cst_5 : f32 to vector<8x128xf32>
    %7 = arith.maximumf %5, %6 : vector<8x128xf32>
    %8 = arith.truncf %7 : vector<8x128xf32> to vector<8x128xbf16>
    %c0_6 = arith.constant 0 : index
    %c0_7 = arith.constant 0 : index
    %9 = vector.load %arg4[%c0_6, %c0_7] : memref<128x128xbf16, #tpu.memory_space<vmem>>, vector<128x128xbf16>
    %cst_8 = arith.constant dense<0.000000e+00> : vector<8x128xf32>
    %10 = tpu.matmul %8, %9, %cst_8 {dimension_numbers = #tpu.dot_dimension_numbers<[1], [0], [0], [1], [0, 0, 1, 1], [], []>} : vector<8x128xbf16>, vector<128x128xbf16>, vector<8x128xf32> -> vector<8x128xf32>
    %c0_9 = arith.constant 0 : index
    %c0_10 = arith.constant 0 : index
    %11 = vector.load %arg5[%c0_9, %c0_10] : memref<1x128xf32, #tpu.memory_space<vmem>>, vector<1x128xf32>
    %12 = vector.broadcast %11 : vector<1x128xf32> to vector<8x128xf32>
    %13 = arith.addf %10, %12 : vector<8x128xf32>
    %cst_11 = arith.constant 0.000000e+00 : f32
    %14 = vector.broadcast %cst_11 : f32 to vector<8x128xf32>
    %15 = arith.maximumf %13, %14 : vector<8x128xf32>
    %16 = arith.truncf %15 : vector<8x128xf32> to vector<8x128xbf16>
    %c0_12 = arith.constant 0 : index
    %c0_13 = arith.constant 0 : index
    %17 = vector.load %arg6[%c0_12, %c0_13] : memref<128x128xbf16, #tpu.memory_space<vmem>>, vector<128x128xbf16>
    %cst_14 = arith.constant dense<0.000000e+00> : vector<8x128xf32>
    %18 = tpu.matmul %16, %17, %cst_14 {dimension_numbers = #tpu.dot_dimension_numbers<[1], [0], [0], [1], [0, 0, 1, 1], [], []>} : vector<8x128xbf16>, vector<128x128xbf16>, vector<8x128xf32> -> vector<8x128xf32>
    %c0_15 = arith.constant 0 : index
    %c0_16 = arith.constant 0 : index
    %19 = vector.load %arg7[%c0_15, %c0_16] : memref<1x128xf32, #tpu.memory_space<vmem>>, vector<1x128xf32>
    %20 = vector.broadcast %19 : vector<1x128xf32> to vector<8x128xf32>
    %21 = arith.addf %18, %20 : vector<8x128xf32>
    %c0_17 = arith.constant 0 : index
    %c0_18 = arith.constant 0 : index
    %22 = vector.load %arg8[%c0_17, %c0_18] : memref<8x128xf32, #tpu.memory_space<vmem>>, vector<8x128xf32>
    tpu.vector_store %arg8[%c0_17, %c0_18], %21 {strides = array<i32>} : memref<8x128xf32, #tpu.memory_space<vmem>>, vector<8x128xf32>,
    return
  }
  func.func @transform_0(%arg0: i32) -> (i32, i32) {
    %c0_i32 = arith.constant 0 : i32
    %c0_i32_0 = arith.constant 0 : i32
    return %arg0, %c0_i32 : i32, i32
  }
  func.func @transform_1(%arg0: i32) -> (i32, i32) {
    %c0_i32 = arith.constant 0 : i32
    %c0_i32_0 = arith.constant 0 : i32
    %c0_i32_1 = arith.constant 0 : i32
    return %c0_i32, %c0_i32_0 : i32, i32
  }
  func.func @transform_2(%arg0: i32) -> (i32, i32) {
    %c0_i32 = arith.constant 0 : i32
    %c0_i32_0 = arith.constant 0 : i32
    %c0_i32_1 = arith.constant 0 : i32
    return %c0_i32, %c0_i32_0 : i32, i32
  }
  func.func @transform_3(%arg0: i32) -> (i32, i32) {
    %c0_i32 = arith.constant 0 : i32
    %c0_i32_0 = arith.constant 0 : i32
    %c0_i32_1 = arith.constant 0 : i32
    return %c0_i32, %c0_i32_0 : i32, i32
  }
  func.func @transform_4(%arg0: i32) -> (i32, i32) {
    %c0_i32 = arith.constant 0 : i32
    %c0_i32_0 = arith.constant 0 : i32
    %c0_i32_1 = arith.constant 0 : i32
    return %c0_i32, %c0_i32_0 : i32, i32
  }
  func.func @transform_5(%arg0: i32) -> (i32, i32) {
    %c0_i32 = arith.constant 0 : i32
    %c0_i32_0 = arith.constant 0 : i32
    %c0_i32_1 = arith.constant 0 : i32
    return %c0_i32, %c0_i32_0 : i32, i32
  }
  func.func @transform_6(%arg0: i32) -> (i32, i32) {
    %c0_i32 = arith.constant 0 : i32
    %c0_i32_0 = arith.constant 0 : i32
    %c0_i32_1 = arith.constant 0 : i32
    return %c0_i32, %c0_i32_0 : i32, i32
  }
  func.func @transform_7(%arg0: i32) -> (i32, i32) {
    %c0_i32 = arith.constant 0 : i32
    %c0_i32_0 = arith.constant 0 : i32
    return %arg0, %c0_i32 : i32, i32
  }
}

</mosaic_0001>

<bundles_post_ra>
// kernel: net_forward.3
= control target key start
LH: loop header
LB: loop body
LE: loop exit
PB: predicated region body
PF: predicated region fallthrough
CT: control target
= control target key end

     0   :  { %s1085_s12 = smov 0   ;;  %s1087_s13 = smov 0   ;;  %s1278_s0 = inlined_call_operand.vmem [shape: bf16[4,80,512], index: 0, kind: input, shape index: {}]   ;;  %s1279_s1 = inlined_call_operand.vmem [shape: bf16[8,80], index: 1, kind: input, shape index: {}]   ;;  %s1280_s2 = inlined_call_operand.vmem [shape: f32[8,1], index: 2, kind: input, shape index: {}]   ;;  %s1281_s3 = inlined_call_operand.vmem [shape: bf16[8,512], index: 3, kind: output, shape index: {}]  }
   0x1   :  { %s1089_s14 = smov 0  }
   0x2 LB: > { %s864_s15 = sadd.s32 4294967295, %s1062_s14   ;;  %s1102_s16 = sadd.s32 1, %s1062_s14   ;;  %s1062_s14 = sphi %s1089_s14, %s1284_s14   ;;  %s1058_s13 = sphi %s1087_s13, %s1283_s13   ;;  %s1054_s12 = sphi %s1085_s12, %s1282_s12  }
   0x3   : > { %s17_s17 = ssub.s32 %s1062_s14, %s1102_s16  ;;  %s20_s18 = sadd.s32 1, %s1058_s13 }
   0x4   : > { %p18_p0 = scmp.eq.s32.totalorder %s17_s17, 0  ;;  %p27_p1 = scmp.ne.s32.totalorder %s1058_s13, %s1054_s12 }
   0x5   : > { %p28_p2 = scmp.eq.s32.totalorder %s1062_s14, 0  ;;  %p867_p4 = scmp.ge.s32.totalorder %s1062_s14, 2 }
   0x6   : > { %s1111_s19 = scalar_select %p18_p0, %s1058_s13, %s20_s18  }
   0x7   : > { %p29_p3 = por %p28_p2, %p27_p1  ;;  %127 = sbr.rel (%p867_p4) target bundleno = 38 (0x26), region = 24 }
   0xe   : > { %130 = sbr.rel (!%p29_p3) target bundleno = 38 (0x26), region = 28  ;;  %s132_s20 = sand.u32 (%p29_p3), 1, %s1058_s13  }
   0xf   : > { %s950_s21 = sshll.u32 (%p29_p3), %s1062_s14, 3  ;;  %s952_s22 = smul.u32 (%p29_p3), 320, %s132_s20 }
  0x10   : > { %s1119_s25 = scalar_lea.vmem (%p29_p3), %s1278_s0, %s950_s21 }
  0x11   : > { %v243_v0 = vld [vmem:[%s1119_s25] sm:$0xff] (%p29_p3)  ;;  %v245_v1 = vld [vmem:[%s1119_s25 + $0x10] sm:$0xff] (%p29_p3)  ;;  %s1127_s26 = scalar_lea.vmem (%p29_p3), [#allocation2], %s952_s22 }
  0x12   : > { %v247_v2 = vld [vmem:[%s1119_s25 + $0x20] sm:$0xff] (%p29_p3)  ;;  %v249_v3 = vld [vmem:[%s1119_s25 + $0x30] sm:$0xff] (%p29_p3)  ;;  %244 = vst [vmem:[%s1127_s26] sm:$0xff] (%p29_p3), %v243_v0  ;;  %246 = vst [vmem:[%s1127_s26 + $0x8] sm:$0xff] (%p29_p3), %v245_v1 }
  0x13   : > { %v251_v4 = vld [vmem:[%s1119_s25 + $0x40] sm:$0xff] (%p29_p3)  ;;  %v253_v5 = vld [vmem:[%s1119_s25 + $0x50] sm:$0xff] (%p29_p3)  ;;  %248 = vst [vmem:[%s1127_s26 + $0x10] sm:$0xff] (%p29_p3), %v247_v2  ;;  %250 = vst [vmem:[%s1127_s26 + $0x18] sm:$0xff] (%p29_p3), %v249_v3 }
  0x14   : > { %252 = vst [vmem:[%s1127_s26 + $0x20] sm:$0xff] (%p29_p3), %v251_v4  ;;  %254 = vst [vmem:[%s1127_s26 + $0x28] sm:$0xff] (%p29_p3), %v253_v5  ;;  %v255_v6 = vld [vmem:[%s1119_s25 + $0x60] sm:$0xff] (%p29_p3)  ;;  %v257_v7 = vld [vmem:[%s1119_s25 + $0x70] sm:$0xff] (%p29_p3) }
  0x15   : > { %v259_v8 = vld [vmem:[%s1119_s25 + $0x80] sm:$0xff]  ;;  %256 = vst [vmem:[%s1127_s26 + $0x30] sm:$0xff] %v255_v6  ;;  %258 = vst [vmem:[%s1127_s26 + $0x38] sm:$0xff] %v257_v7  ;;  %v261_v9 = vld [vmem:[%s1119_s25 + $0x90] sm:$0xff] }
  0x16   : > { %260 = vst [vmem:[%s1127_s26 + $0x40] sm:$0xff] %v259_v8  ;;  %v263_v10 = vld [vmem:[%s1119_s25 + $0xa0] sm:$0xff]  ;;  %v265_v11 = vld [vmem:[%s1119_s25 + $0xb0] sm:$0xff]  ;;  %262 = vst [vmem:[%s1127_s26 + $0x48] sm:$0xff] %v261_v9 }
  0x17   : > { %264 = vst [vmem:[%s1127_s26 + $0x50] sm:$0xff] %v263_v10  ;;  %266 = vst [vmem:[%s1127_s26 + $0x58] sm:$0xff] %v265_v11  ;;  %v267_v12 = vld [vmem:[%s1119_s25 + $0xc0] sm:$0xff]  ;;  %v269_v13 = vld [vmem:[%s1119_s25 + $0xd0] sm:$0xff] }
  0x18   : > { %v271_v14 = vld [vmem:[%s1119_s25 + $0xe0] sm:$0xff]  ;;  %268 = vst [vmem:[%s1127_s26 + $0x60] sm:$0xff] %v267_v12  ;;  %270 = vst [vmem:[%s1127_s26 + $0x68] sm:$0xff] %v269_v13  ;;  %v273_v15 = vld [vmem:[%s1119_s25 + $0xf0] sm:$0xff] }
  0x19   : > { %272 = vst [vmem:[%s1127_s26 + $0x70] sm:$0xff] %v271_v14  ;;  %v275_v16 = vld [vmem:[%s1119_s25 + $0x100] sm:$0xff]  ;;  %v277_v17 = vld [vmem:[%s1119_s25 + $0x110] sm:$0xff]  ;;  %274 = vst [vmem:[%s1127_s26 + $0x78] sm:$0xff] %v273_v15 }
  0x1a   : > { %276 = vst [vmem:[%s1127_s26 + $0x80] sm:$0xff] %v275_v16  ;;  %278 = vst [vmem:[%s1127_s26 + $0x88] sm:$0xff] %v277_v17  ;;  %v279_v18 = vld [vmem:[%s1119_s25 + $0x120] sm:$0xff]  ;;  %v281_v19 = vld [vmem:[%s1119_s25 + $0x130] sm:$0xff] }
  0x1b   : > { %v283_v20 = vld [vmem:[%s1119_s25 + $0x140] sm:$0xff]  ;;  %280 = vst [vmem:[%s1127_s26 + $0x90] sm:$0xff] %v279_v18  ;;  %282 = vst [vmem:[%s1127_s26 + $0x98] sm:$0xff] %v281_v19  ;;  %v285_v21 = vld [vmem:[%s1119_s25 + $0x150] sm:$0xff] }
  0x1c   : > { %284 = vst [vmem:[%s1127_s26 + $0xa0] sm:$0xff] %v283_v20  ;;  %v287_v22 = vld [vmem:[%s1119_s25 + $0x160] sm:$0xff]  ;;  %v289_v23 = vld [vmem:[%s1119_s25 + $0x170] sm:$0xff]  ;;  %286 = vst [vmem:[%s1127_s26 + $0xa8] sm:$0xff] %v285_v21 }
  0x1d   : > { %288 = vst [vmem:[%s1127_s26 + $0xb0] sm:$0xff] %v287_v22  ;;  %290 = vst [vmem:[%s1127_s26 + $0xb8] sm:$0xff] %v289_v23  ;;  %v291_v24 = vld [vmem:[%s1119_s25 + $0x180] sm:$0xff]  ;;  %v293_v25 = vld [vmem:[%s1119_s25 + $0x190] sm:$0xff] }
  0x1e   : > { %v295_v26 = vld [vmem:[%s1119_s25 + $0x1a0] sm:$0xff]  ;;  %292 = vst [vmem:[%s1127_s26 + $0xc0] sm:$0xff] %v291_v24  ;;  %294 = vst [vmem:[%s1127_s26 + $0xc8] sm:$0xff] %v293_v25  ;;  %v297_v27 = vld [vmem:[%s1119_s25 + $0x1b0] sm:$0xff] }
  0x1f   : > { %296 = vst [vmem:[%s1127_s26 + $0xd0] sm:$0xff] %v295_v26  ;;  %v299_v28 = vld [vmem:[%s1119_s25 + $0x1c0] sm:$0xff]  ;;  %v301_v29 = vld [vmem:[%s1119_s25 + $0x1d0] sm:$0xff]  ;;  %298 = vst [vmem:[%s1127_s26 + $0xd8] sm:$0xff] %v297_v27 }
  0x20   : > { %300 = vst [vmem:[%s1127_s26 + $0xe0] sm:$0xff] %v299_v28  ;;  %302 = vst [vmem:[%s1127_s26 + $0xe8] sm:$0xff] %v301_v29  ;;  %v303_v30 = vld [vmem:[%s1119_s25 + $0x1e0] sm:$0xff]  ;;  %v305_v31 = vld [vmem:[%s1119_s25 + $0x1f0] sm:$0xff] }
  0x21   : > { %v307_v32 = vld [vmem:[%s1119_s25 + $0x200] sm:$0xff]  ;;  %304 = vst [vmem:[%s1127_s26 + $0xf0] sm:$0xff] %v303_v30  ;;  %306 = vst [vmem:[%s1127_s26 + $0xf8] sm:$0xff] %v305_v31  ;;  %v309_v33 = vld [vmem:[%s1119_s25 + $0x210] sm:$0xff] }
  0x22   : > { %308 = vst [vmem:[%s1127_s26 + $0x100] sm:$0xff] %v307_v32  ;;  %v311_v34 = vld [vmem:[%s1119_s25 + $0x220] sm:$0xff]  ;;  %v313_v35 = vld [vmem:[%s1119_s25 + $0x230] sm:$0xff]  ;;  %310 = vst [vmem:[%s1127_s26 + $0x108] sm:$0xff] %v309_v33 }
  0x23   : > { %312 = vst [vmem:[%s1127_s26 + $0x110] sm:$0xff] %v311_v34  ;;  %314 = vst [vmem:[%s1127_s26 + $0x118] sm:$0xff] %v313_v35  ;;  %v315_v36 = vld [vmem:[%s1119_s25 + $0x240] sm:$0xff]  ;;  %v317_v37 = vld [vmem:[%s1119_s25 + $0x250] sm:$0xff] }
  0x24   : > { %v319_v38 = vld [vmem:[%s1119_s25 + $0x260] sm:$0xff]  ;;  %316 = vst [vmem:[%s1127_s26 + $0x120] sm:$0xff] %v315_v36  ;;  %318 = vst [vmem:[%s1127_s26 + $0x128] sm:$0xff] %v317_v37  ;;  %v321_v39 = vld [vmem:[%s1119_s25 + $0x270] sm:$0xff] }
  0x25   : > { %320 = vst [vmem:[%s1127_s26 + $0x130] sm:$0xff] %v319_v38  ;;  %322 = vst [vmem:[%s1127_s26 + $0x138] sm:$0xff] %v321_v39 }
  0x26 PF: > { %p870_p5 = scmp.ge.s32.totalorder %s1062_s14, 1  ;;  %p327_p6 = scmp.lt.s32.totalorder %s1062_s14, 3 }
  0x28   : > { %p328_p7 = pnand %p870_p5, %p327_p6 }
  0x29   : > { %s334_s27 = sand.u32 (!%p328_p7), 1, %s1054_s12   ;;  %v783_v40 = vld [vmem:[%s1280_s2] sm:$0xff] (!%p328_p7)  ;;  %v1064_v41 = vmov (!%p328_p7), 0   ;;  %vm426_vm0 = vcmask (!%p328_p7), 654336   ;;  %s871_s7 = sshll.u32 (!%p328_p7), %s864_s15, 1 }
  0x2a   : > { %331 = sbr.rel (%p328_p7) target bundleno = 311 (0x137), region = 66  ;;  %462 = vmatprep.mubr.bf16.mxu0 (!%p328_p7), %v1064_v41  ;;  %564 = vmatprep.mubr.bf16.mxu1 (!%p328_p7), %v1064_v41  ;;  %v365_v0 = vld [vmem:[%s1279_s1] sm:$0xf] (!%p328_p7)  ;;  %p359_p8 = scmp.lt.s32.totalorder (!%p328_p7), %s871_s7, 3 }
  0x2b   : > { %s953_s30 = smul.u32 (!%p328_p7), 320, %s334_s27  ;;  %979 = vset.pattern.permute.xlu0 (!%p328_p7), %v1064_v41 }
  0x2c   : > { %786 = vperm.xlu0 (!%p328_p7), %979, %v783_v40  }
  0x2d   : > { %s1212_s4 = scalar_lea.vmem (!%p328_p7), [#allocation2], %s953_s30 }
  0x2e   : > { %v980_v42 = vld [vmem:[%s1212_s4 + $0x4] ss:$8 sps:$4 sm:$0xff] (!%p328_p7)   ;;  %v982_v43 = vld [vmem:[%s1212_s4 + $0x54] ss:$8 sps:$4 sm:$0xff] (!%p328_p7)   ;;  %v984_v44 = vld [vmem:[%s1212_s4] ss:$8 sps:$4 sm:$0xff] (!%p328_p7)  }
  0x2f   : > { %430 = vmatprep.subr.bf16.mxu0 (!%p328_p7), %v980_v42  ;;  %v985_v45 = vld [vmem:[%s1212_s4 + $0x50] ss:$8 sps:$4 sm:$0xff] (!%p328_p7)   ;;  %532 = vmatprep.subr.bf16.mxu1 (!%p328_p7), %v982_v43  ;;  %v986_v46 = vld [vmem:[%s1212_s4 + $0x14] ss:$8 sps:$4 sm:$0xff] (!%p328_p7)   ;;  %v988_v47 = vld [vmem:[%s1212_s4 + $0x64] ss:$8 sps:$4 sm:$0xff] (!%p328_p7)  }
  0x30   : > { %431 = vmatpush1.bf16.msra.mxu0 (!%p328_p7), %v984_v44  ;;  %533 = vmatpush1.bf16.msra.mxu1 (!%p328_p7), %v985_v45  ;;  %v990_v48 = vld [vmem:[%s1212_s4 + $0x10] ss:$8 sps:$4 sm:$0xff] (!%p328_p7)   ;;  %v991_v49 = vld [vmem:[%s1212_s4 + $0x60] ss:$8 sps:$4 sm:$0xff] (!%p328_p7)   ;;  %v992_v50 = vld [vmem:[%s1212_s4 + $0x24] ss:$8 sps:$4 sm:$0xff] (!%p328_p7)  }
  0x31   : > { %432 = vmatprep.subr.bf16.mxu0 %v986_v46  ;;  %534 = vmatprep.subr.bf16.mxu1 %v988_v47  ;;  %v994_v51 = vld [vmem:[%s1212_s4 + $0x74] ss:$8 sps:$4 sm:$0xff]   ;;  %v996_v52 = vld [vmem:[%s1212_s4 + $0x20] ss:$8 sps:$4 sm:$0xff]   ;;  %v997_v53 = vld [vmem:[%s1212_s4 + $0x70] ss:$8 sps:$4 sm:$0xff]  }
  0x32   : > { %v998_v54 = vld [vmem:[%s1212_s4 + $0x34] ss:$8 sps:$4 sm:$0xff]   ;;  %v1000_v55 = vld [vmem:[%s1212_s4 + $0x84] ss:$8 sps:$4 sm:$0xff]   ;;  %v1002_v56 = vld [vmem:[%s1212_s4 + $0x30] ss:$8 sps:$4 sm:$0xff]  }
  0x33   : > { %v1003_v57 = vld [vmem:[%s1212_s4 + $0x80] ss:$8 sps:$4 sm:$0xff]   ;;  %v1004_v58 = vld [vmem:[%s1212_s4 + $0x44] ss:$8 sps:$4 sm:$0xff]   ;;  %v1006_v59 = vld [vmem:[%s1212_s4 + $0x94] ss:$8 sps:$4 sm:$0xff]  }
  0x34   : > { %433 = vmatpush1.bf16.msra.mxu0 %v990_v48  ;;  %535 = vmatpush1.bf16.msra.mxu1 %v991_v49  ;;  %v1008_v60 = vld [vmem:[%s1212_s4 + $0x40] ss:$8 sps:$4 sm:$0xff]   ;;  %v1009_v61 = vld [vmem:[%s1212_s4 + $0x90] ss:$8 sps:$4 sm:$0xff]   ;;  %v1012_v62 = vld [vmem:[%s1212_s4 + $0xa4] ss:$8 sps:$4 sm:$0xff]  }
  0x35   : > { %434 = vmatprep.subr.bf16.mxu0 %v992_v50  ;;  %536 = vmatprep.subr.bf16.mxu1 %v994_v51  ;;  %v1015_v63 = vld [vmem:[%s1212_s4 + $0xf4] ss:$8 sps:$4 sm:$0xff]   ;;  %v1010_v1 = vld [vmem:[%s1212_s4 + $0xa0] ss:$8 sps:$4 sm:$0xff]   ;;  %v1013_v2 = vld [vmem:[%s1212_s4 + $0xf0] ss:$8 sps:$4 sm:$0xff]  }
  0x36   : > { %v1018_v3 = vld [vmem:[%s1212_s4 + $0xb4] ss:$8 sps:$4 sm:$0xff]   ;;  %v1021_v4 = vld [vmem:[%s1212_s4 + $0x104] ss:$8 sps:$4 sm:$0xff]   ;;  %v1016_v5 = vld [vmem:[%s1212_s4 + $0xb0] ss:$8 sps:$4 sm:$0xff]  }
  0x37   : > { %v1019_v6 = vld [vmem:[%s1212_s4 + $0x100] ss:$8 sps:$4 sm:$0xff]   ;;  %v1024_v7 = vld [vmem:[%s1212_s4 + $0xc4] ss:$8 sps:$4 sm:$0xff]   ;;  %v1027_v8 = vld [vmem:[%s1212_s4 + $0x114] ss:$8 sps:$4 sm:$0xff]  }
  0x38   : > { %435 = vmatpush1.bf16.msra.mxu0 %v996_v52  ;;  %537 = vmatpush1.bf16.msra.mxu1 %v997_v53  ;;  %v1022_v9 = vld [vmem:[%s1212_s4 + $0xc0] ss:$8 sps:$4 sm:$0xff]   ;;  %v1025_v10 = vld [vmem:[%s1212_s4 + $0x110] ss:$8 sps:$4 sm:$0xff]   ;;  %v1030_v11 = vld [vmem:[%s1212_s4 + $0xd4] ss:$8 sps:$4 sm:$0xff]  }
  0x39   : > { %436 = vmatprep.subr.bf16.mxu0 %v998_v54  ;;  %538 = vmatprep.subr.bf16.mxu1 %v1000_v55  ;;  %v1033_v12 = vld [vmem:[%s1212_s4 + $0x124] ss:$8 sps:$4 sm:$0xff]   ;;  %v1028_v13 = vld [vmem:[%s1212_s4 + $0xd0] ss:$8 sps:$4 sm:$0xff]   ;;  %v1031_v14 = vld [vmem:[%s1212_s4 + $0x120] ss:$8 sps:$4 sm:$0xff]  }
  0x3a   : > { %v1036_v15 = vld [vmem:[%s1212_s4 + $0xe4] ss:$8 sps:$4 sm:$0xff]   ;;  %v1039_v16 = vld [vmem:[%s1212_s4 + $0x134] ss:$8 sps:$4 sm:$0xff]   ;;  %v1034_v17 = vld [vmem:[%s1212_s4 + $0xe0] ss:$8 sps:$4 sm:$0xff]  }
  0x3b   : > { %v1037_v18 = vld [vmem:[%s1212_s4 + $0x130] ss:$8 sps:$4 sm:$0xff]   ;;  %s1286_s7 = smov (!%p359_p8, %s871_s7), 3 }
  0x3c   : > { %437 = vmatpush1.bf16.msra.mxu0 %v1002_v56  ;;  %539 = vmatpush1.bf16.msra.mxu1 %v1003_v57  ;;  %s872_s8 = sshll.u32 %s1286_s7, 2 }
  0x3d   : > { %438 = vmatprep.subr.bf16.mxu0 %v1004_v58  ;;  %540 = vmatprep.subr.bf16.mxu1 %v1006_v59  ;;  %s362_s11 = scalar_lea.vmem %s1281_s3, %s872_s8 }
  0x40   : > { %439 = vmatpush1.bf16.msra.mxu0 %v1008_v60  ;;  %541 = vmatpush1.bf16.msra.mxu1 %v1009_v61 }
  0x41   : > { %636 = vmatprep.subr.bf16.mxu0 %v1012_v62  ;;  %740 = vmatprep.subr.bf16.mxu1 %v1015_v63 }
  0x43   : > { %883 = vmatmul.mubr.msk.bf16.vlgmr.msra.gmra.mrb[0].mxu0 %vm426_vm0, %v365_v0  ;;  %904 = vmatmul.mubr.msk.bf16.vlgmr.msra.gmra.mrb[0].mxu1 %vm426_vm0, %v365_v0 }
  0x44   : > { %637 = vmatpush1.bf16.msra.mxu0 %v1010_v1  ;;  %741 = vmatpush1.bf16.msra.mxu1 %v1013_v2 }
  0x45   : > { %638 = vmatprep.subr.bf16.mxu0 %v1018_v3  ;;  %742 = vmatprep.subr.bf16.mxu1 %v1021_v4 }
  0x46   : > { %668 = vmatprep.mubr.bf16.mxu0 %v1064_v41  ;;  %772 = vmatprep.mubr.bf16.mxu1 %v1064_v41 }
  0x48   : > { %639 = vmatpush1.bf16.msra.mxu0 %v1016_v5  ;;  %743 = vmatpush1.bf16.msra.mxu1 %v1019_v6 }
  0x49   : > { %640 = vmatprep.subr.bf16.mxu0 %v1024_v7  ;;  %744 = vmatprep.subr.bf16.mxu1 %v1027_v8 }
  0x4c   : > { %641 = vmatpush1.bf16.msra.mxu0 %v1022_v9  ;;  %745 = vmatpush1.bf16.msra.mxu1 %v1025_v10 }
  0x4d   : > { %642 = vmatprep.subr.bf16.mxu0 %v1030_v11  ;;  %746 = vmatprep.subr.bf16.mxu1 %v1033_v12 }
  0x50   : > { %643 = vmatpush1.bf16.msra.mxu0 %v1028_v13  ;;  %747 = vmatpush1.bf16.msra.mxu1 %v1031_v14 }
  0x51   : > { %644 = vmatprep.subr.bf16.mxu0 %v1036_v15  ;;  %748 = vmatprep.subr.bf16.mxu1 %v1039_v16 }
  0x54   : > { %645 = vmatpush1.bf16.msra.mxu0 %v1034_v17  ;;  %749 = vmatpush1.bf16.msra.mxu1 %v1037_v18 }
  0x57   : > { %925 = vmatmul.mubr.msk.bf16.vlgmr.msra.gmra.mrb[4].mxu0 %vm426_vm0, %v365_v0  ;;  %946 = vmatmul.mubr.msk.bf16.vlgmr.msra.gmra.mrb[4].mxu1 %vm426_vm0, %v365_v0 }
  0xab   : > { %v787_v29 = vpop.permute.xlu0 %786 }
 0x116   : > { %v464_v19 = vpop.f32.mrb[0].mxu0  ;;  %v566_v20 = vpop.f32.mrb[0].mxu1 }
 0x117   : > { %v573_v21 = vmax.f32 %v464_v19, %v566_v20  ;;  %v466_v22 = vpop.f32.mrb[1].mxu0  ;;  %v568_v23 = vpop.f32.mrb[1].mxu1 }
 0x118   : > { %v574_v24 = vmax.f32 %v466_v22, %v568_v23  ;;  %v468_v25 = vpop.f32.mrb[2].mxu0  ;;  %v570_v26 = vpop.f32.mrb[2].mxu1 }
 0x119   : > { %v469_v27 = vpop.f32.mrb[3].mxu0  ;;  %v571_v28 = vpop.f32.mrb[3].mxu1 }
 0x12a   : > { %v670_v30 = vpop.f32.mrb[4].mxu0  ;;  %v774_v31 = vpop.f32.mrb[4].mxu1 }
 0x12b   : > { %v677_v32 = vmax.f32 %v573_v21, %v670_v30  ;;  %v672_v33 = vpop.f32.mrb[5].mxu0  ;;  %v776_v34 = vpop.f32.mrb[5].mxu1 }
 0x12c   : > { %v678_v35 = vmax.f32 %v574_v24, %v672_v33  ;;  %v674_v36 = vpop.f32.mrb[6].mxu0  ;;  %v778_v37 = vpop.f32.mrb[6].mxu1 }
 0x12d   : > { %v781_v38 = vmax.f32 %v677_v32, %v774_v31  ;;  %v675_v39 = vpop.f32.mrb[7].mxu0  ;;  %v779_v40 = vpop.f32.mrb[7].mxu1 }
 0x12e   : > { %v782_v41 = vmax.f32 %v678_v35, %v776_v34 }
 0x12f   : > { %v789_v42 = vadd.f32 %v787_v29, %v781_v38 }
 0x130   : > { %v790_v43 = vadd.f32 %v787_v29, %v782_v41 }
 0x131   : > { %v791_v44 = vmax.f32 %v789_v42, 0.0 }
 0x132   : > { %v792_v45 = vmax.f32 %v790_v43, 0.0 }
 0x134   : > { %v951_v46 = vpack.c.bf16 %v792_v45, %v791_v44 }
 0x136   : > { %801 = vst [vmem:[%s362_s11] sm:$0xff] %v951_v46 }
 0x137 PF: > { %p10_p9 = scmp.ge.s32.totalorder %s1102_s16, 4   ;;  %s1282_s12 = smov %s1058_s13 }
 0x138   : > { %s1283_s13 = smov %s1111_s19  ;;  %s1284_s14 = smov %s1102_s16 }
 0x139   :  { %12 = sbr.rel (!%p10_p9) target bundleno = 2 (0x2), region = 108 }

// kernel: net_forward.4
= control target key start
LH: loop header
LB: loop body
LE: loop exit
PB: predicated region body
PF: predicated region fallthrough
CT: control target
= control target key end

     0   :  { %v851_v0 = vmov 0   ;;  %vm130_vm0 = vcmask 654336   ;;  %s1106_s0 = inlined_call_operand.vmem [shape: bf16[4,208,128], index: 0, kind: input, shape index: {}]   ;;  %s1107_s1 = inlined_call_operand.vmem [shape: bf16[16,208], index: 1, kind: input, shape index: {}]   ;;  %s1108_s2 = inlined_call_operand.vmem [shape: f32[16,1], index: 2, kind: input, shape index: {}]   ;;  %s1109_s3 = inlined_call_operand.vmem [shape: bf16[16,128], index: 3, kind: output, shape index: {}]  }
   0x1   :  { %134 = vmatprep.subr.bf16.mxu0 %v851_v0  ;;  %280 = vmatprep.subr.bf16.mxu1 %v851_v0  ;;  %v796_v1 = vld [vmem:[%s1106_s0] sm:$0xff]   ;;  %v797_v2 = vld [vmem:[%s1106_s0 + $0x68] sm:$0xff]   ;;  %v799_v4 = vld [vmem:[%s1106_s0 + $0x70] sm:$0xff]  }
   0x2   :  { %795 = vset.pattern.permute.xlu0 %v851_v0  ;;  %135 = vmatpush1.bf16.msra.mxu0 %v796_v1  ;;  %v798_v3 = vld [vmem:[%s1106_s0 + $0x8] sm:$0xff]   ;;  %v800_v5 = vld [vmem:[%s1106_s0 + $0x10] sm:$0xff]   ;;  %v801_v6 = vld [vmem:[%s1106_s0 + $0x78] sm:$0xff]  }
   0x3   :  { %281 = vmatpush1.bf16.msra.mxu1 %v797_v2  ;;  %136 = vmatprep.subr.bf16.mxu0 %v851_v0  ;;  %v802_v7 = vld [vmem:[%s1106_s0 + $0x18] sm:$0xff]   ;;  %v803_v8 = vld [vmem:[%s1106_s0 + $0x80] sm:$0xff]   ;;  %v805_v10 = vld [vmem:[%s1106_s0 + $0x88] sm:$0xff]  }
   0x4   :  { %282 = vmatprep.subr.bf16.mxu1 %v851_v0  ;;  %v804_v9 = vld [vmem:[%s1106_s0 + $0x20] sm:$0xff]   ;;  %v806_v11 = vld [vmem:[%s1106_s0 + $0x28] sm:$0xff]   ;;  %v807_v12 = vld [vmem:[%s1106_s0 + $0x90] sm:$0xff]  }
   0x5   :  { %v808_v13 = vld [vmem:[%s1106_s0 + $0x30] sm:$0xff]   ;;  %v809_v14 = vld [vmem:[%s1106_s0 + $0x98] sm:$0xff]   ;;  %v822_v16 = vld [vmem:[%s1107_s1 + $0x4] ss:$8 sps:$4 sm:$0xff]  }
   0x6   :  { %137 = vmatpush1.bf16.msra.mxu0 %v798_v3  ;;  %v810_v15 = vld [vmem:[%s1106_s0 + $0x38] sm:$0xff]   ;;  %v811_v17 = vld [vmem:[%s1106_s0 + $0xa0] sm:$0xff]   ;;  %664 = vmatprep.mubr.msk.bf16.mxu0 %vm130_vm0, %v822_v16  ;;  %v813_v19 = vld [vmem:[%s1106_s0 + $0xa8] sm:$0xff]  }
   0x7   :  { %283 = vmatpush1.bf16.msra.mxu1 %v799_v4  ;;  %138 = vmatprep.subr.bf16.mxu0 %v851_v0  ;;  %v812_v18 = vld [vmem:[%s1106_s0 + $0x40] sm:$0xff]   ;;  %v814_v20 = vld [vmem:[%s1106_s0 + $0x48] sm:$0xff]   ;;  %v815_v21 = vld [vmem:[%s1106_s0 + $0xb0] sm:$0xff]  }
   0x8   :  { %284 = vmatprep.subr.bf16.mxu1 %v851_v0  ;;  %704 = vmatprep.mubr.msk.bf16.mxu1 %vm130_vm0, %v822_v16  ;;  %v816_v22 = vld [vmem:[%s1106_s0 + $0x50] sm:$0xff]   ;;  %v817_v23 = vld [vmem:[%s1106_s0 + $0xb8] sm:$0xff]   ;;  %v819_v25 = vld [vmem:[%s1106_s0 + $0xc0] sm:$0xff]  }
   0x9   :  { %v818_v24 = vld [vmem:[%s1106_s0 + $0x58] sm:$0xff]   ;;  %v820_v26 = vld [vmem:[%s1106_s0 + $0x60] sm:$0xff]   ;;  %v821_v27 = vld [vmem:[%s1106_s0 + $0xc8] sm:$0xff]  }
   0xa   :  { %139 = vmatpush1.bf16.msra.mxu0 %v800_v5  ;;  %v985_v28 = vld [vmem:[%s1107_s1] ss:$8 sps:$4 sm:$0xff]   ;;  %v825_v29 = vld [vmem:[%s1106_s0 + $0xd0] sm:$0xff]   ;;  %v826_v30 = vld [vmem:[%s1106_s0 + $0x138] sm:$0xff]  }
   0xb   :  { %285 = vmatpush1.bf16.msra.mxu1 %v801_v6  ;;  %140 = vmatprep.subr.bf16.mxu0 %v851_v0  ;;  %v827_v31 = vld [vmem:[%s1106_s0 + $0xd8] sm:$0xff]   ;;  %v619_v32 = vld [vmem:[%s1108_s2] sm:$0xff]  ;;  %v620_v35 = vld [vmem:[%s1108_s2 + $0x8] sm:$0xff] }
   0xc   :  { %286 = vmatprep.subr.bf16.mxu1 %v851_v0  ;;  %v828_v33 = vld [vmem:[%s1106_s0 + $0x140] sm:$0xff]   ;;  %623 = vperm.xlu0 %795, %v619_v32   ;;  %v830_v36 = vld [vmem:[%s1106_s0 + $0x148] sm:$0xff]   ;;  %v832_v38 = vld [vmem:[%s1106_s0 + $0x150] sm:$0xff]  }
   0xd   :  { %v829_v34 = vld [vmem:[%s1106_s0 + $0xe0] sm:$0xff]   ;;  %v831_v37 = vld [vmem:[%s1106_s0 + $0xe8] sm:$0xff]   ;;  %v833_v39 = vld [vmem:[%s1106_s0 + $0xf0] sm:$0xff]  }
   0xe   :  { %141 = vmatpush1.bf16.msra.mxu0 %v802_v7  ;;  %v834_v40 = vld [vmem:[%s1106_s0 + $0x158] sm:$0xff]   ;;  %v836_v42 = vld [vmem:[%s1106_s0 + $0x160] sm:$0xff]   ;;  %v838_v44 = vld [vmem:[%s1106_s0 + $0x168] sm:$0xff]  }
   0xf   :  { %287 = vmatpush1.bf16.msra.mxu1 %v803_v8  ;;  %142 = vmatprep.subr.bf16.mxu0 %v851_v0  ;;  %v835_v41 = vld [vmem:[%s1106_s0 + $0xf8] sm:$0xff]   ;;  %v837_v43 = vld [vmem:[%s1106_s0 + $0x100] sm:$0xff]   ;;  %v839_v45 = vld [vmem:[%s1106_s0 + $0x108] sm:$0xff]  }
  0x10   :  { %288 = vmatprep.subr.bf16.mxu1 %v851_v0  ;;  %628 = vperm.xlu0 %795, %v620_v35   ;;  %v840_v46 = vld [vmem:[%s1106_s0 + $0x170] sm:$0xff]   ;;  %v842_v48 = vld [vmem:[%s1106_s0 + $0x178] sm:$0xff]   ;;  %v844_v50 = vld [vmem:[%s1106_s0 + $0x180] sm:$0xff]  }
  0x11   :  { %v841_v47 = vld [vmem:[%s1106_s0 + $0x110] sm:$0xff]   ;;  %v843_v49 = vld [vmem:[%s1106_s0 + $0x118] sm:$0xff]   ;;  %v845_v51 = vld [vmem:[%s1106_s0 + $0x120] sm:$0xff]  }
  0x12   :  { %143 = vmatpush1.bf16.msra.mxu0 %v804_v9  ;;  %v846_v52 = vld [vmem:[%s1106_s0 + $0x188] sm:$0xff]   ;;  %v848_v54 = vld [vmem:[%s1106_s0 + $0x190] sm:$0xff]   ;;  %v850_v56 = vld [vmem:[%s1106_s0 + $0x198] sm:$0xff]  }
  0x13   :  { %289 = vmatpush1.bf16.msra.mxu1 %v805_v10  ;;  %144 = vmatprep.subr.bf16.mxu0 %v851_v0  ;;  %v847_v53 = vld [vmem:[%s1106_s0 + $0x128] sm:$0xff]   ;;  %v849_v55 = vld [vmem:[%s1106_s0 + $0x130] sm:$0xff]  }
  0x14   :  { %290 = vmatprep.subr.bf16.mxu1 %v851_v0 }
  0x16   :  { %145 = vmatpush1.bf16.msra.mxu0 %v806_v11 }
  0x17   :  { %291 = vmatpush1.bf16.msra.mxu1 %v807_v12  ;;  %146 = vmatprep.subr.bf16.mxu0 %v851_v0 }
  0x18   :  { %292 = vmatprep.subr.bf16.mxu1 %v851_v0 }
  0x1a   :  { %147 = vmatpush1.bf16.msra.mxu0 %v808_v13 }
  0x1b   :  { %293 = vmatpush1.bf16.msra.mxu1 %v809_v14  ;;  %148 = vmatprep.subr.bf16.mxu0 %v851_v0 }
  0x1c   :  { %294 = vmatprep.subr.bf16.mxu1 %v851_v0 }
  0x1e   :  { %149 = vmatpush1.bf16.msra.mxu0 %v810_v15 }
  0x1f   :  { %295 = vmatpush1.bf16.msra.mxu1 %v811_v17  ;;  %150 = vmatprep.subr.bf16.mxu0 %v851_v0 }
  0x20   :  { %296 = vmatprep.subr.bf16.mxu1 %v851_v0 }
  0x22   :  { %151 = vmatpush1.bf16.msra.mxu0 %v812_v18 }
  0x23   :  { %297 = vmatpush1.bf16.msra.mxu1 %v813_v19  ;;  %152 = vmatprep.subr.bf16.mxu0 %v851_v0 }
  0x24   :  { %298 = vmatprep.subr.bf16.mxu1 %v851_v0 }
  0x26   :  { %153 = vmatpush1.bf16.msra.mxu0 %v814_v20 }
  0x27   :  { %299 = vmatpush1.bf16.msra.mxu1 %v815_v21  ;;  %154 = vmatprep.subr.bf16.mxu0 %v851_v0 }
  0x28   :  { %300 = vmatprep.subr.bf16.mxu1 %v851_v0 }
  0x2a   :  { %155 = vmatpush1.bf16.msra.mxu0 %v816_v22 }
  0x2b   :  { %301 = vmatpush1.bf16.msra.mxu1 %v817_v23  ;;  %156 = vmatprep.subr.bf16.mxu0 %v851_v0 }
  0x2c   :  { %302 = vmatprep.subr.bf16.mxu1 %v851_v0 }
  0x2e   :  { %157 = vmatpush1.bf16.msra.mxu0 %v818_v24 }
  0x2f   :  { %303 = vmatpush1.bf16.msra.mxu1 %v819_v25  ;;  %158 = vmatprep.subr.bf16.mxu0 %v851_v0 }
  0x30   :  { %304 = vmatprep.subr.bf16.mxu1 %v851_v0 }
  0x32   :  { %159 = vmatpush1.bf16.msra.mxu0 %v820_v26 }
  0x33   :  { %305 = vmatpush1.bf16.msra.mxu1 %v821_v27  ;;  %428 = vmatprep.subr.bf16.mxu0 %v851_v0 }
  0x34   :  { %576 = vmatprep.subr.bf16.mxu1 %v851_v0 }
  0x35   :  { %167 = vmatmul.mubr.bf16.vlgmr.msra.gmra.mrb[0].mxu0 %v985_v28 }
  0x36   :  { %313 = vmatmul.mubr.bf16.vlgmr.msra.gmra.mrb[0].mxu1 %v985_v28  ;;  %429 = vmatpush1.bf16.msra.mxu0 %v825_v29 }
  0x37   :  { %577 = vmatpush1.bf16.msra.mxu1 %v826_v30  ;;  %430 = vmatprep.subr.bf16.mxu0 %v851_v0 }
  0x38   :  { %578 = vmatprep.subr.bf16.mxu1 %v851_v0  ;;  %744 = vmatprep.mubr.msk.bf16.mxu0 %vm130_vm0, %v822_v16 }
  0x39   :  { %784 = vmatprep.mubr.msk.bf16.mxu1 %vm130_vm0, %v822_v16 }
  0x3a   :  { %431 = vmatpush1.bf16.msra.mxu0 %v827_v31 }
  0x3b   :  { %579 = vmatpush1.bf16.msra.mxu1 %v828_v33  ;;  %432 = vmatprep.subr.bf16.mxu0 %v851_v0 }
  0x3c   :  { %580 = vmatprep.subr.bf16.mxu1 %v851_v0 }
  0x3e   :  { %433 = vmatpush1.bf16.msra.mxu0 %v829_v34 }
  0x3f   :  { %581 = vmatpush1.bf16.msra.mxu1 %v830_v36  ;;  %434 = vmatprep.subr.bf16.mxu0 %v851_v0 }
  0x40   :  { %582 = vmatprep.subr.bf16.mxu1 %v851_v0 }
  0x42   :  { %435 = vmatpush1.bf16.msra.mxu0 %v831_v37 }
  0x43   :  { %583 = vmatpush1.bf16.msra.mxu1 %v832_v38  ;;  %436 = vmatprep.subr.bf16.mxu0 %v851_v0 }
  0x44   :  { %584 = vmatprep.subr.bf16.mxu1 %v851_v0 }
  0x46   :  { %437 = vmatpush1.bf16.msra.mxu0 %v833_v39 }
  0x47   :  { %585 = vmatpush1.bf16.msra.mxu1 %v834_v40  ;;  %438 = vmatprep.subr.bf16.mxu0 %v851_v0 }
  0x48   :  { %586 = vmatprep.subr.bf16.mxu1 %v851_v0 }
  0x4a   :  { %439 = vmatpush1.bf16.msra.mxu0 %v835_v41 }
  0x4b   :  { %587 = vmatpush1.bf16.msra.mxu1 %v836_v42  ;;  %440 = vmatprep.subr.bf16.mxu0 %v851_v0 }
  0x4c   :  { %588 = vmatprep.subr.bf16.mxu1 %v851_v0 }
  0x4e   :  { %441 = vmatpush1.bf16.msra.mxu0 %v837_v43 }
  0x4f   :  { %589 = vmatpush1.bf16.msra.mxu1 %v838_v44  ;;  %442 = vmatprep.subr.bf16.mxu0 %v851_v0 }
  0x50   :  { %590 = vmatprep.subr.bf16.mxu1 %v851_v0 }
  0x52   :  { %443 = vmatpush1.bf16.msra.mxu0 %v839_v45 }
  0x53   :  { %591 = vmatpush1.bf16.msra.mxu1 %v840_v46  ;;  %444 = vmatprep.subr.bf16.mxu0 %v851_v0 }
  0x54   :  { %592 = vmatprep.subr.bf16.mxu1 %v851_v0 }
  0x56   :  { %445 = vmatpush1.bf16.msra.mxu0 %v841_v47 }
  0x57   :  { %593 = vmatpush1.bf16.msra.mxu1 %v842_v48  ;;  %446 = vmatprep.subr.bf16.mxu0 %v851_v0 }
  0x58   :  { %594 = vmatprep.subr.bf16.mxu1 %v851_v0 }
  0x5a   :  { %447 = vmatpush1.bf16.msra.mxu0 %v843_v49 }
  0x5b   :  { %595 = vmatpush1.bf16.msra.mxu1 %v844_v50  ;;  %448 = vmatprep.subr.bf16.mxu0 %v851_v0 }
  0x5c   :  { %596 = vmatprep.subr.bf16.mxu1 %v851_v0 }
  0x5e   :  { %449 = vmatpush1.bf16.msra.mxu0 %v845_v51 }
  0x5f   :  { %597 = vmatpush1.bf16.msra.mxu1 %v846_v52  ;;  %450 = vmatprep.subr.bf16.mxu0 %v851_v0 }
  0x60   :  { %598 = vmatprep.subr.bf16.mxu1 %v851_v0 }
  0x62   :  { %451 = vmatpush1.bf16.msra.mxu0 %v847_v53 }
  0x63   :  { %599 = vmatpush1.bf16.msra.mxu1 %v848_v54  ;;  %452 = vmatprep.subr.bf16.mxu0 %v851_v0 }
  0x64   :  { %600 = vmatprep.subr.bf16.mxu1 %v851_v0 }
  0x66   :  { %453 = vmatpush1.bf16.msra.mxu0 %v849_v55 }
  0x67   :  { %601 = vmatpush1.bf16.msra.mxu1 %v850_v56 }
  0x69   :  { %461 = vmatmul.mubr.bf16.vlgmr.msra.gmra.mrb[4].mxu0 %v985_v28 }
  0x6a   :  { %609 = vmatmul.mubr.bf16.vlgmr.msra.gmra.mrb[4].mxu1 %v985_v28 }
  0x8b   :  { %v624_v4 = vpop.permute.xlu0 %623 }
  0x8f   :  { %v629_v17 = vpop.permute.xlu0 %628 }
 0x108   :  { %v168_v57 = vpop.f32.mrb[0].mxu0 }
 0x109   :  { %v314_v58 = vpop.f32.mrb[0].mxu1  ;;  %v170_v59 = vpop.f32.mrb[1].mxu0 }
 0x10a   :  { %v321_v60 = vmax.f32 %v168_v57, %v314_v58  ;;  %v316_v61 = vpop.f32.mrb[1].mxu1  ;;  %v171_v62 = vpop.f32.mrb[2].mxu0 }
 0x10b   :  { %v317_v63 = vpop.f32.mrb[2].mxu1  ;;  %v173_v1 = vpop.f32.mrb[3].mxu0 }
 0x10c   :  { %v322_v2 = vmax.f32 %v171_v62, %v317_v63  ;;  %v319_v3 = vpop.f32.mrb[3].mxu1 }
 0x13c   :  { %v462_v5 = vpop.f32.mrb[4].mxu0 }
 0x13d   :  { %v469_v6 = vmax.f32 %v321_v60, %v462_v5  ;;  %v610_v0 = vpop.f32.mrb[4].mxu1  ;;  %v464_v7 = vpop.f32.mrb[5].mxu0 }
 0x13e   :  { %v612_v8 = vpop.f32.mrb[5].mxu1  ;;  %v465_v9 = vpop.f32.mrb[6].mxu0 }
 0x13f   :  { %v617_v10 = vmax.f32 %v469_v6, %v610_v0  ;;  %v470_v11 = vmax.f32 %v322_v2, %v465_v9  ;;  %v613_v12 = vpop.f32.mrb[6].mxu1  ;;  %v467_v13 = vpop.f32.mrb[7].mxu0 }
 0x140   :  { %v615_v14 = vpop.f32.mrb[7].mxu1 }
 0x141   :  { %v631_v15 = vadd.f32 %v624_v4, %v617_v10  ;;  %v618_v16 = vmax.f32 %v470_v11, %v613_v12 }
 0x143   :  { %v632_v18 = vadd.f32 %v629_v17, %v618_v16  ;;  %v633_v19 = vmax.f32 %v631_v15, 0.0 }
 0x145   :  { %v634_v20 = vmax.f32 %v632_v18, 0.0 }
 0x147   :  { %v792_v21 = vpack.c.bf16 %v634_v20, %v633_v19 }
 0x149   :  { %793 = vst [vmem:[%s1109_s3] sm:$0xff] %v792_v21  }

// kernel: net_forward.5
= control target key start
LH: loop header
LB: loop body
LE: loop exit
PB: predicated region body
PF: predicated region fallthrough
CT: control target
= control target key end

     0   :  { %v741_v0 = vmov 0   ;;  %vm249_vm0 = vcmask 130048   ;;  %v742_v32 = vmov 0.0   ;;  %vm743_vm1 = vmmov 0   ;;  %s952_s1 = inlined_call_operand.vmem [shape: bf16[400,128], index: 1, kind: input, shape index: {}]   ;;  %s953_s0 = inlined_call_operand.vmem [shape: bf16[8,400], index: 0, kind: input, shape index: {}]   ;;  %s954_s3 = inlined_call_operand.vmem [shape: bf16[128,128], index: 3, kind: input, shape index: {}]   ;;  %s955_s5 = inlined_call_operand.vmem [shape: bf16[128,128], index: 5, kind: input, shape index: {}]   ;;  %s956_s2 = inlined_call_operand.vmem [shape: f32[1,128], index: 2, kind: input, shape index: {}]   ;;  %s957_s4 = inlined_call_operand.vmem [shape: f32[1,128], index: 4, kind: input, shape index: {}]   ;;  %s958_s6 = inlined_call_operand.vmem [shape: f32[1,128], index: 6, kind: input, shape index: {}]   ;;  %s959_s7 = inlined_call_operand.vmem [shape: f32[8,128], index: 7, kind: output, shape index: {}]  }
   0x1   :  { %293 = vmatprep.subr.bf16.mxu1 %v741_v0  ;;  %v696_v1 = vld [vmem:[%s952_s1 + $0x40] sm:$0xff]   ;;  %v699_v4 = vld [vmem:[%s952_s1 + $0x48] sm:$0xff]   ;;  %v702_v7 = vld [vmem:[%s952_s1 + $0x50] sm:$0xff]  }
   0x2   :  { %v697_v2 = vld [vmem:[%s952_s1 + $0x80] sm:$0xff]   ;;  %613 = vmatprep.subr.bf16.mxu0 %v696_v1  ;;  %v700_v5 = vld [vmem:[%s952_s1 + $0x88] sm:$0xff]   ;;  %v703_v8 = vld [vmem:[%s952_s1 + $0x90] sm:$0xff]  }
   0x3   :  { %v698_v3 = vld [vmem:[%s952_s1] sm:$0xff]   ;;  %294 = vmatpush1.bf16.msra.mxu1 %v697_v2  ;;  %v701_v6 = vld [vmem:[%s952_s1 + $0x8] sm:$0xff]   ;;  %v704_v9 = vld [vmem:[%s952_s1 + $0x10] sm:$0xff]  }
   0x4   :  { %614 = vmatpush3.bf16.msra.mxu0 %v698_v3  ;;  %295 = vmatprep.subr.bf16.mxu1 %v741_v0  ;;  %v705_v10 = vld [vmem:[%s952_s1 + $0x58] sm:$0xff]   ;;  %v708_v13 = vld [vmem:[%s952_s1 + $0x60] sm:$0xff]   ;;  %v711_v16 = vld [vmem:[%s952_s1 + $0x68] sm:$0xff]  }
   0x5   :  { %615 = vmatprep.subr.bf16.mxu0 %v699_v4  ;;  %v706_v11 = vld [vmem:[%s952_s1 + $0x98] sm:$0xff]   ;;  %v709_v14 = vld [vmem:[%s952_s1 + $0xa0] sm:$0xff]   ;;  %v712_v17 = vld [vmem:[%s952_s1 + $0xa8] sm:$0xff]  }
   0x6   :  { %v707_v12 = vld [vmem:[%s952_s1 + $0x18] sm:$0xff]   ;;  %v710_v15 = vld [vmem:[%s952_s1 + $0x20] sm:$0xff]   ;;  %v713_v18 = vld [vmem:[%s952_s1 + $0x28] sm:$0xff]  }
   0x7   :  { %296 = vmatpush1.bf16.msra.mxu1 %v700_v5  ;;  %v714_v19 = vld [vmem:[%s952_s1 + $0x70] sm:$0xff]   ;;  %v27_v22 = vld [vmem:[%s953_s0] sm:$0xff]  ;;  %v717_v23 = vld [vmem:[%s952_s1 + $0x78] sm:$0xff]  }
   0x8   :  { %616 = vmatpush3.bf16.msra.mxu0 %v701_v6  ;;  %297 = vmatprep.subr.bf16.mxu1 %v741_v0  ;;  %v715_v20 = vld [vmem:[%s952_s1 + $0xb0] sm:$0xff]   ;;  %v566_v24 = vcombine.high %v27_v22, %v27_v22  ;;  %v28_v25 = vld [vmem:[%s953_s0 + $0x8] sm:$0xff]  ;;  %v718_v27 = vld [vmem:[%s952_s1 + $0xb8] sm:$0xff]   ;;  %v565_v30 = vcombine.low %v27_v22, %v27_v22 }
   0x9   :  { %617 = vmatprep.subr.bf16.mxu0 %v702_v7  ;;  %v716_v21 = vld [vmem:[%s952_s1 + $0x30] sm:$0xff]   ;;  %v568_v26 = vcombine.high %v28_v25, %v28_v25  ;;  %v719_v28 = vld [vmem:[%s952_s1 + $0x38] sm:$0xff]   ;;  %v722_v29 = vld [vmem:[%s952_s1 + $0xc0] sm:$0xff]   ;;  %v567_v33 = vcombine.low %v28_v25, %v28_v25 }
   0xa   :  { %285 = vmatprep.mubr.bf16.mxu0 %v566_v24  ;;  %v725_v31 = vld [vmem:[%s954_s3] sm:$0xff]   ;;  %v726_v34 = vld [vmem:[%s954_s3 + $0x8] sm:$0xff]   ;;  %v727_v35 = vld [vmem:[%s954_s3 + $0x10] sm:$0xff]  }
   0xb   :  { %298 = vmatpush1.bf16.msra.mxu1 %v703_v8  ;;  %594 = vmatprep.mubr.msk.bf16.mxu1 %vm249_vm0, %v568_v26  ;;  %v728_v36 = vld [vmem:[%s954_s3 + $0x18] sm:$0xff]   ;;  %v729_v37 = vld [vmem:[%s954_s3 + $0x20] sm:$0xff]   ;;  %v730_v38 = vld [vmem:[%s954_s3 + $0x28] sm:$0xff]  }
   0xc   :  { %618 = vmatpush3.bf16.msra.mxu0 %v704_v9  ;;  %299 = vmatprep.subr.bf16.mxu1 %v741_v0  ;;  %v731_v39 = vld [vmem:[%s954_s3 + $0x30] sm:$0xff]   ;;  %v732_v40 = vld [vmem:[%s954_s3 + $0x38] sm:$0xff]   ;;  %v733_v41 = vld [vmem:[%s955_s5] sm:$0xff]  }
   0xd   :  { %619 = vmatprep.subr.bf16.mxu0 %v705_v10  ;;  %v734_v42 = vld [vmem:[%s955_s5 + $0x8] sm:$0xff]   ;;  %v735_v43 = vld [vmem:[%s955_s5 + $0x10] sm:$0xff]   ;;  %v736_v44 = vld [vmem:[%s955_s5 + $0x18] sm:$0xff]  }
   0xe   :  { %v737_v45 = vld [vmem:[%s955_s5 + $0x20] sm:$0xff]   ;;  %v738_v46 = vld [vmem:[%s955_s5 + $0x28] sm:$0xff]   ;;  %v739_v61 = vld [vmem:[%s955_s5 + $0x30] sm:$0xff]  }
   0xf   :  { %300 = vmatpush1.bf16.msra.mxu1 %v706_v11  ;;  %v564_v49 = vld [vmem:[%s956_s2] ss:$0 sm:$0xff]  ;;  %v740_v62 = vld [vmem:[%s955_s5 + $0x38] sm:$0xff]  }
  0x10   :  { %620 = vmatpush3.bf16.msra.mxu0 %v707_v12  ;;  %301 = vmatprep.subr.bf16.mxu1 %v741_v0  ;;  %v595_v63 = vld [vmem:[%s957_s4] ss:$0 sm:$0xff] }
  0x11   :  { %621 = vmatprep.subr.bf16.mxu0 %v708_v13  ;;  %v604_v7 = vld [vmem:[%s958_s6] ss:$0 sm:$0xff] }
  0x13   :  { %302 = vmatpush1.bf16.msra.mxu1 %v709_v14 }
  0x14   :  { %622 = vmatpush3.bf16.msra.mxu0 %v710_v15  ;;  %303 = vmatprep.subr.bf16.mxu1 %v741_v0 }
  0x15   :  { %623 = vmatprep.subr.bf16.mxu0 %v711_v16 }
  0x17   :  { %304 = vmatpush1.bf16.msra.mxu1 %v712_v17 }
  0x18   :  { %624 = vmatpush3.bf16.msra.mxu0 %v713_v18  ;;  %305 = vmatprep.subr.bf16.mxu1 %v741_v0 }
  0x19   :  { %625 = vmatprep.subr.bf16.mxu0 %v714_v19 }
  0x1b   :  { %306 = vmatpush1.bf16.msra.mxu1 %v715_v20 }
  0x1c   :  { %626 = vmatpush3.bf16.msra.mxu0 %v716_v21  ;;  %307 = vmatprep.subr.bf16.mxu1 %v741_v0 }
  0x1d   :  { %627 = vmatprep.subr.bf16.mxu0 %v717_v23 }
  0x1f   :  { %308 = vmatpush1.bf16.msra.mxu1 %v718_v27 }
  0x20   :  { %628 = vmatpush3.bf16.msra.mxu0 %v719_v28  ;;  %309 = vmatprep.subr.bf16.mxu1 %v741_v0 }
  0x21   :  { %653 = vmatprep.subr.bf16.mxu0 %v742_v32 }
  0x23   :  { %286 = vmatmul.mubr.bf16.vlgmr.msra.gmra.mrb[0].mxu0 %v565_v30  ;;  %310 = vmatpush1.bf16.msra.mxu1 %v722_v29 }
  0x24   :  { %654 = vmatpush3.bf16.msra.mxu0 %v725_v31  ;;  %673 = vmatprep.subr.bf16.mxu1 %v742_v32 }
  0x25   :  { %655 = vmatprep.subr.bf16.mxu0 %v742_v32  ;;  %669 = vmatprep.mubr.msk.bf16.mxu0 %vm743_vm1, %v742_v32 }
  0x26   :  { %326 = vmatmul.mubr.bf16.vlgmr.msra.gmra.mrb[0].mxu1 %v567_v33 }
  0x27   :  { %689 = vmatprep.mubr.msk.bf16.mxu1 %vm743_vm1, %v742_v32  ;;  %674 = vmatpush3.bf16.msra.mxu1 %v733_v41 }
  0x28   :  { %656 = vmatpush3.bf16.msra.mxu0 %v726_v34  ;;  %675 = vmatprep.subr.bf16.mxu1 %v742_v32 }
  0x29   :  { %657 = vmatprep.subr.bf16.mxu0 %v742_v32 }
  0x2b   :  { %676 = vmatpush3.bf16.msra.mxu1 %v734_v42 }
  0x2c   :  { %658 = vmatpush3.bf16.msra.mxu0 %v727_v35  ;;  %677 = vmatprep.subr.bf16.mxu1 %v742_v32 }
  0x2d   :  { %659 = vmatprep.subr.bf16.mxu0 %v742_v32 }
  0x2f   :  { %678 = vmatpush3.bf16.msra.mxu1 %v735_v43 }
  0x30   :  { %660 = vmatpush3.bf16.msra.mxu0 %v728_v36  ;;  %679 = vmatprep.subr.bf16.mxu1 %v742_v32 }
  0x31   :  { %661 = vmatprep.subr.bf16.mxu0 %v742_v32 }
  0x33   :  { %680 = vmatpush3.bf16.msra.mxu1 %v736_v44 }
  0x34   :  { %662 = vmatpush3.bf16.msra.mxu0 %v729_v37  ;;  %681 = vmatprep.subr.bf16.mxu1 %v742_v32 }
  0x35   :  { %663 = vmatprep.subr.bf16.mxu0 %v742_v32 }
  0x37   :  { %682 = vmatpush3.bf16.msra.mxu1 %v737_v45 }
  0x38   :  { %664 = vmatpush3.bf16.msra.mxu0 %v730_v38  ;;  %683 = vmatprep.subr.bf16.mxu1 %v742_v32 }
  0x39   :  { %665 = vmatprep.subr.bf16.mxu0 %v742_v32 }
  0x3b   :  { %684 = vmatpush3.bf16.msra.mxu1 %v738_v46 }
  0x3c   :  { %666 = vmatpush3.bf16.msra.mxu0 %v731_v39  ;;  %685 = vmatprep.subr.bf16.mxu1 %v742_v32 }
  0x3d   :  { %667 = vmatprep.subr.bf16.mxu0 %v742_v32 }
  0x3f   :  { %686 = vmatpush3.bf16.msra.mxu1 %v739_v61 }
  0x40   :  { %668 = vmatpush3.bf16.msra.mxu0 %v732_v40  ;;  %687 = vmatprep.subr.bf16.mxu1 %v742_v32 }
  0x43   :  { %688 = vmatpush3.bf16.msra.mxu1 %v740_v62 }
  0xf6   :  { %v629_v47 = vpop.f32.mrb[0].mxu0 }
  0xf7   :  { %v630_v48 = vpop.f32.mrb[1].mxu0 }
  0xf8   :  { %v631_v50 = vadd.f32 %v630_v48, %v629_v47  ;;  %v632_v51 = vpop.f32.mrb[2].mxu0 }
  0xf9   :  { %v633_v52 = vpop.f32.mrb[3].mxu0  ;;  %v327_v53 = vpop.f32.mrb[0].mxu1 }
  0xfa   :  { %v288_v54 = vadd.f32 %v631_v50, %v564_v49  ;;  %v329_v55 = vpop.f32.mrb[1].mxu1 }
  0xfb   :  { %v330_v56 = vpop.f32.mrb[2].mxu1 }
  0xfc   :  { %v328_v57 = vadd.f32 %v327_v53, %v288_v54  ;;  %v331_v58 = vpop.f32.mrb[3].mxu1 }
  0xfe   :  { %v333_v59 = vmax.f32 %v328_v57, 0.0 }
 0x100   :  { %v334_v60 = vpack.c.bf16 %v333_v59, %v333_v59 }
 0x102   :  { %670 = vmatmul.mubr.bf16.vlgmr.msra.gmra.mrb[4].mxu0 %v334_v60 }
 0x1d5   :  { %v440_v0 = vpop.f32.mrb[4].mxu0 }
 0x1d6   :  { %v441_v1 = vadd.f32 %v595_v63, %v440_v0  ;;  %v671_v2 = vpop.f32.mrb[5].mxu0 }
 0x1d7   :  { %v443_v3 = vpop.f32.mrb[6].mxu0 }
 0x1d8   :  { %v446_v4 = vmax.f32 %v441_v1, 0.0  ;;  %v672_v5 = vpop.f32.mrb[7].mxu0 }
 0x1da   :  { %v447_v6 = vpack.c.bf16 %v446_v4, %v446_v4 }
 0x1dc   :  { %690 = vmatmul.mubr.bf16.vlgmr.msra.gmra.mrb[4].mxu1 %v447_v6 }
 0x2af   :  { %v553_v8 = vpop.f32.mrb[4].mxu1 }
 0x2b0   :  { %v554_v9 = vadd.f32 %v604_v7, %v553_v8  ;;  %v691_v10 = vpop.f32.mrb[5].mxu1 }
 0x2b1   :  { %v556_v11 = vpop.f32.mrb[6].mxu1 }
 0x2b2   :  { %559 = vst [vmem:[%s959_s7] sm:$0xff] %v554_v9  ;;  %v692_v12 = vpop.f32.mrb[7].mxu1 }

</bundles_post_ra>
